<compile_context>
chip_gen: v6e
topology: v6e:2x2x1
jax: 0.10.0
libtpu: 0.0.40
codegen_flags: <defaults>
</compile_context>

<pallas_src>
import jax
import jax.numpy as jnp
from jax import lax
from jax.experimental import pallas as pl
from jax.experimental.pallas import tpu as pltpu

DIM = 10          # input features
D = 20            # hidden width of linear1
HIDDEN_DIM = 5    # output features of linear2


def _round_up(n, m):
    return ((n + m - 1) // m) * m


def two_layer_kernel(x_ref, w1_ref, w2_ref, o_ref):
    # x_ref : (TB, DIM)        -- natural layout batch tile
    # w1_ref: (D, DIM)         -- torch layout, resident in VMEM across steps
    # w2_ref: (HIDDEN_DIM, D)  -- torch layout, resident in VMEM across steps
    # o_ref : (TB, HIDDEN_DIM) -- natural layout output tile
    x = x_ref[...]
    # linear1: x @ w1.T  (contract x dim 1 with w1 dim 1)
    h = lax.dot_general(x, w1_ref[...], (((1,), (1,)), ((), ())),
                        preferred_element_type=jnp.float32)
    h = jnp.maximum(h, 0.0)                                   # relu
    # linear2: h @ w2.T
    y = lax.dot_general(h, w2_ref[...], (((1,), (1,)), ((), ())),
                        preferred_element_type=jnp.float32)
    # round(sigmoid(y)) == 1 iff y > 0  (sigmoid(0)=0.5 rounds to 0 under
    # round-half-to-even), so the EUP transcendental + round is skipped.
    o_ref[...] = jnp.where(y > 0.0, 1.0, 0.0).astype(o_ref.dtype)


def two_layer_net(x, w1, w2, tb=8192):
    """x: (B, DIM) f32; w1: (D, DIM) torch layout; w2: (HIDDEN_DIM, D) torch layout.

    Returns (B, HIDDEN_DIM) f32 of rounded sigmoid outputs (0.0 / 1.0).
    tb ~ 8192 is a good default for v5e/v6e; v7x can push 16K-32K.
    """
    B, dim = x.shape
    d_hidden = w1.shape[0]
    h_out = w2.shape[0]

    # Batch tile: multiple of 128 rows, at most `tb`, and capped at ~B/2 so the
    # batch grid keeps >=2 steps when B is large (v7x megacore sharding).
    TB = min(tb, _round_up(max(pl.cdiv(B, 2), 1), 128))
    grid = (pl.cdiv(B, TB),)  # ragged last block allowed; OOB rows never written

    # VMEM budget: x/out blocks pad their last dim to 128 lanes
    # (~512 B per row per buffer, double-buffered) + matmul intermediates.
    # ~3 KiB/row => ~24-28 MiB at TB=8192; 48 MiB limit leaves headroom and
    # stays under v7x's 64 MiB physical VMEM.
    vmem_limit = 48 << 20

    out = pl.pallas_call(
        two_layer_kernel,
        out_shape=jax.ShapeDtypeStruct((B, h_out), jnp.float32),
        grid=grid,
        in_specs=[
            pl.BlockSpec((TB, dim), lambda i: (i, 0)),          # batch-tiled x, natural layout
            pl.BlockSpec((d_hidden, dim), lambda i: (0, 0)),    # w1 resident across steps
            pl.BlockSpec((h_out, d_hidden), lambda i: (0, 0)),  # w2 resident across steps
        ],
        out_specs=pl.BlockSpec((TB, h_out), lambda i: (i, 0)),  # natural layout output
        compiler_params=pltpu.CompilerParams(
            dimension_semantics=("parallel",),                  # shard batch tiles over TCs
            vmem_limit_bytes=vmem_limit),
    )(x, w1, w2)

    return out


if __name__ == "__main__":
    key = jax.random.PRNGKey(0)
    kx, k1, k2, kx2 = jax.random.split(key, 4)

    # deterministic "parameter" init mimicking nn.Linear (bias=False) shapes:
    # linear1.weight: (D, dim), linear2.weight: (hidden_dim, D)
    bound1 = 1.0 / (DIM ** 0.5)
    bound2 = 1.0 / (D ** 0.5)
    w1 = jax.random.uniform(k1, (D, DIM), jnp.float32, -bound1, bound1)
    w2 = jax.random.uniform(k2, (HIDDEN_DIM, D), jnp.float32, -bound2, bound2)

    def ref_fn(xv):
        return jnp.round(jax.nn.sigmoid(jnp.maximum(xv @ w1.T, 0.0) @ w2.T))

    # small batch (single partial block)
    batch = 8
    x = jax.random.normal(kx, (batch, DIM), jnp.float32)
    out = two_layer_net(x, w1, w2)
    jax.block_until_ready(out)
    assert out.shape == (batch, HIDDEN_DIM)
    assert jnp.allclose(out, ref_fn(x)), "mismatch vs reference (small batch)"

    # ragged multi-step grid (exercises partial last block + resident weights)
    batch2 = 300
    x2 = jax.random.normal(kx2, (batch2, DIM), jnp.float32)
    out2 = two_layer_net(x2, w1, w2)
    jax.block_until_ready(out2)
    assert out2.shape == (batch2, HIDDEN_DIM)
    assert jnp.allclose(out2, ref_fn(x2)), "mismatch vs reference (ragged grid)"

    print("KERNEL_OK")
</pallas_src>

<mosaic_0001>
module attributes {stable_mosaic.version = 11 : i64} {
  func.func @two_layer_kernel(%arg0: i32, %arg1: memref<128x10xf32, #tpu.memory_space<vmem>>, %arg2: memref<20x10xf32, #tpu.memory_space<vmem>>, %arg3: memref<5x20xf32, #tpu.memory_space<vmem>>, %arg4: memref<128x5xf32, #tpu.memory_space<vmem>>) attributes {dimension_semantics = [#tpu.dimension_semantics<parallel>], iteration_bounds = array<i64: 1>, scalar_prefetch = 0 : i64, scratch_operands = 0 : i64, tpu.core_type = #tpu.core_type<tc>, window_params = [{transform_indices = @transform_0, window_bounds = array<i64: 128, 10>}, {pipeline_mode = #tpu.pipeline_mode<synchronous>, transform_indices = @transform_1, window_bounds = array<i64: 20, 10>}, {pipeline_mode = #tpu.pipeline_mode<synchronous>, transform_indices = @transform_2, window_bounds = array<i64: 5, 20>}, {transform_indices = @transform_3, window_bounds = array<i64: 128, 5>}]} {
    %c0 = arith.constant 0 : index
    %c0_0 = arith.constant 0 : index
    %0 = vector.load %arg1[%c0, %c0_0] : memref<128x10xf32, #tpu.memory_space<vmem>>, vector<128x10xf32>
    %c0_1 = arith.constant 0 : index
    %c0_2 = arith.constant 0 : index
    %1 = vector.load %arg2[%c0_1, %c0_2] : memref<20x10xf32, #tpu.memory_space<vmem>>, vector<20x10xf32>
    %cst = arith.constant dense<0.000000e+00> : vector<128x20xf32>
    %2 = tpu.matmul %0, %1, %cst {dimension_numbers = #tpu.dot_dimension_numbers<[1], [1], [0], [0], [0, 0, 1, 0], [], []>} : vector<128x10xf32>, vector<20x10xf32>, vector<128x20xf32> -> vector<128x20xf32>
    %cst_3 = arith.constant 0.000000e+00 : f32
    %3 = vector.broadcast %cst_3 : f32 to vector<128x20xf32>
    %4 = arith.maximumf %2, %3 : vector<128x20xf32>
    %c0_4 = arith.constant 0 : index
    %c0_5 = arith.constant 0 : index
    %5 = vector.load %arg3[%c0_4, %c0_5] : memref<5x20xf32, #tpu.memory_space<vmem>>, vector<5x20xf32>
    %cst_6 = arith.constant dense<0.000000e+00> : vector<128x5xf32>
    %6 = tpu.matmul %4, %5, %cst_6 {dimension_numbers = #tpu.dot_dimension_numbers<[1], [1], [0], [0], [0, 0, 1, 0], [], []>} : vector<128x20xf32>, vector<5x20xf32>, vector<128x5xf32> -> vector<128x5xf32>
    %cst_7 = arith.constant 0.000000e+00 : f32
    %7 = vector.broadcast %cst_7 : f32 to vector<128x5xf32>
    %8 = arith.cmpf ogt, %6, %7 : vector<128x5xf32>
    %cst_8 = arith.constant 1.000000e+00 : f32
    %cst_9 = arith.constant 0.000000e+00 : f32
    %9 = vector.broadcast %cst_8 : f32 to vector<128x5xf32>
    %10 = vector.broadcast %cst_9 : f32 to vector<128x5xf32>
    %11 = arith.select %8, %9, %10 : vector<128x5xi1>, vector<128x5xf32>
    %c0_10 = arith.constant 0 : index
    %c0_11 = arith.constant 0 : index
    %12 = vector.load %arg4[%c0_10, %c0_11] : memref<128x5xf32, #tpu.memory_space<vmem>>, vector<128x5xf32>
    tpu.vector_store %arg4[%c0_10, %c0_11], %11 {strides = array<i32>} : memref<128x5xf32, #tpu.memory_space<vmem>>, vector<128x5xf32>,
    return
  }
  func.func @transform_0(%arg0: i32) -> (i32, i32) {
    %c0_i32 = arith.constant 0 : i32
    %c0_i32_0 = arith.constant 0 : i32
    return %arg0, %c0_i32 : i32, i32
  }
  func.func @transform_1(%arg0: i32) -> (i32, i32) {
    %c0_i32 = arith.constant 0 : i32
    %c0_i32_0 = arith.constant 0 : i32
    %c0_i32_1 = arith.constant 0 : i32
    return %c0_i32, %c0_i32_0 : i32, i32
  }
  func.func @transform_2(%arg0: i32) -> (i32, i32) {
    %c0_i32 = arith.constant 0 : i32
    %c0_i32_0 = arith.constant 0 : i32
    %c0_i32_1 = arith.constant 0 : i32
    return %c0_i32, %c0_i32_0 : i32, i32
  }
  func.func @transform_3(%arg0: i32) -> (i32, i32) {
    %c0_i32 = arith.constant 0 : i32
    %c0_i32_0 = arith.constant 0 : i32
    return %arg0, %c0_i32 : i32, i32
  }
}

</mosaic_0001>

<bundles_post_ra>
// kernel: tpu_custom_call.1
= control target key start
LH: loop header
LB: loop body
LE: loop exit
PB: predicated region body
PF: predicated region fallthrough
CT: control target
= control target key end

     0   :  { %8 = vsyncpa [#allocation3], 0  ;;  %vm34_vm0 = vcmask 80896   ;;  %vm254_vm1 = vcmask 162816   ;;  %vm483_vm2 = vcmask 39936   ;;  %v670_v53 = vmov 0.0   ;;  %s813_s0 = inlined_call_operand.vmem [shape: f32[8,10], index: 0, kind: input, shape index: {}]   ;;  %s814_s1 = inlined_call_operand.vmem [shape: f32[20,10], index: 1, kind: input, shape index: {}]   ;;  %s815_s2 = inlined_call_operand.vmem [shape: f32[5,20], index: 2, kind: input, shape index: {}]   ;;  %s816_s3 = inlined_call_operand.hbm [shape: f32[8,5], index: 3, kind: output, shape index: {}]  }
   0x1   :  { %v33_v0 = vld [vmem:[%s814_s1 + $0x10] sm:$0xf]  ;;  %v32_v1 = vld [vmem:[%s814_s1 + $0x8] sm:$0xff]  ;;  %v15_v2 = vld [vmem:[%s813_s0] sm:$0xff] }
   0x2   :  { %588 = vmatprep.subr.msk.mxu0 %vm34_vm0, %v33_v0  ;;  %594 = vmatprep.mubr.msk.f32.mxu0 %vm34_vm0, %v15_v2  ;;  %v31_v3 = vld [vmem:[%s814_s1] sm:$0xff]  ;;  %v16_v4 = vld [vmem:[%s813_s0 + $0x8] sm:$0xff]  ;;  %v17_v5 = vld [vmem:[%s813_s0 + $0x10] sm:$0xff] }
   0x3   :  { %589 = vmatpush3.xpose.msk.msra.mxu0 %vm34_vm0, %v33_v0  ;;  %v18_v6 = vld [vmem:[%s813_s0 + $0x18] sm:$0xff]  ;;  %v19_v7 = vld [vmem:[%s813_s0 + $0x20] sm:$0xff]  ;;  %v20_v8 = vld [vmem:[%s813_s0 + $0x28] sm:$0xff] }
   0x4   :  { %590 = vmatprep.subr.msk.mxu0 %vm34_vm0, %v32_v1  ;;  %v21_v9 = vld [vmem:[%s813_s0 + $0x30] sm:$0xff]  ;;  %v22_v10 = vld [vmem:[%s813_s0 + $0x38] sm:$0xff]  ;;  %v23_v11 = vld [vmem:[%s813_s0 + $0x40] sm:$0xff] }
   0x5   :  { %v24_v12 = vld [vmem:[%s813_s0 + $0x48] sm:$0xff]  ;;  %v25_v13 = vld [vmem:[%s813_s0 + $0x50] sm:$0xff]  ;;  %v26_v14 = vld [vmem:[%s813_s0 + $0x58] sm:$0xff] }
   0x6   :  { %v27_v15 = vld [vmem:[%s813_s0 + $0x60] sm:$0xff]  ;;  %v28_v16 = vld [vmem:[%s813_s0 + $0x68] sm:$0xff]  ;;  %v29_v17 = vld [vmem:[%s813_s0 + $0x70] sm:$0xff] }
   0x7   :  { %591 = vmatpush3.xpose.msk.msra.mxu0 %vm34_vm0, %v32_v1  ;;  %v30_v18 = vld [vmem:[%s813_s0 + $0x78] sm:$0xff]  ;;  %v253_v19 = vld [vmem:[%s815_s2] sm:$0x1f] }
   0x8   :  { %592 = vmatprep.subr.msk.mxu0 %vm34_vm0, %v31_v3  ;;  %618 = vmatprep.subr.msk.mxu1 %vm254_vm1, %v253_v19 }
   0x9   :  { %619 = vmatpush3.xpose.msk.msra.mxu1 %vm254_vm1, %v253_v19 }
   0xb   :  { %593 = vmatpush3.xpose.msk.msra.mxu0 %vm34_vm0, %v31_v3 }
   0xe   :  { %595 = vmatmul.mubr.msk.f32.vlgmr.msra.gmra.mxu0 %vm34_vm0, %v16_v4 }
   0xf   :  { %597 = vmatprep.mubr.msk.f32.mxu0 %vm34_vm0, %v17_v5 }
  0x12   :  { %598 = vmatmul.mubr.msk.f32.gmra.mxu0 %vm34_vm0, %v18_v6 }
  0x13   :  { %600 = vmatprep.mubr.msk.f32.mxu0 %vm34_vm0, %v19_v7 }
  0x16   :  { %601 = vmatmul.mubr.msk.f32.gmra.mxu0 %vm34_vm0, %v20_v8 }
  0x17   :  { %603 = vmatprep.mubr.msk.f32.mxu0 %vm34_vm0, %v21_v9 }
  0x1a   :  { %604 = vmatmul.mubr.msk.f32.gmra.mxu0 %vm34_vm0, %v22_v10 }
  0x1b   :  { %606 = vmatprep.mubr.msk.f32.mxu0 %vm34_vm0, %v23_v11 }
  0x1e   :  { %607 = vmatmul.mubr.msk.f32.gmra.mxu0 %vm34_vm0, %v24_v12 }
  0x1f   :  { %609 = vmatprep.mubr.msk.f32.mxu0 %vm34_vm0, %v25_v13 }
  0x22   :  { %610 = vmatmul.mubr.msk.f32.gmra.mxu0 %vm34_vm0, %v26_v14 }
  0x23   :  { %612 = vmatprep.mubr.msk.f32.mxu0 %vm34_vm0, %v27_v15 }
  0x26   :  { %613 = vmatmul.mubr.msk.f32.gmra.mxu0 %vm34_vm0, %v28_v16 }
  0x27   :  { %615 = vmatprep.mubr.msk.f32.mxu0 %vm34_vm0, %v29_v17 }
  0x2a   :  { %616 = vmatmul.mubr.msk.f32.gmra.mxu0 %vm34_vm0, %v30_v18 }
  0xce   :  { %v596_v20 = vpop.f32.mrf.mxu0 }
  0xcf   :  { %v238_v23 = vmax.f32 %v596_v20, 0.0 }
  0xd0   :  { %v158_v21 = vpop.f32.mrf.mxu0 }
  0xd1   :  { %v237_v22 = vmax.f32 %v158_v21, 0.0 }
  0xd2   :  { %v599_v24 = vpop.f32.mrf.mxu0 }
  0xd3   :  { %620 = vmatprep.mubr.msk.f32.mxu1 %vm254_vm1, %v237_v22  ;;  %v240_v27 = vmax.f32 %v599_v24, 0.0 }
  0xd4   :  { %v168_v25 = vpop.f32.mrf.mxu0  ;;  %621 = vmatmul.mubr.msk.f32.vlgmr.msra.gmra.mxu1 %vm254_vm1, %v238_v23 }
  0xd5   :  { %v239_v26 = vmax.f32 %v168_v25, 0.0 }
  0xd6   :  { %v602_v28 = vpop.f32.mrf.mxu0 }
  0xd7   :  { %623 = vmatprep.mubr.msk.f32.mxu1 %vm254_vm1, %v239_v26  ;;  %v242_v31 = vmax.f32 %v602_v28, 0.0 }
  0xd8   :  { %v178_v29 = vpop.f32.mrf.mxu0  ;;  %624 = vmatmul.mubr.msk.f32.gmra.mxu1 %vm254_vm1, %v240_v27 }
  0xd9   :  { %v241_v30 = vmax.f32 %v178_v29, 0.0 }
  0xda   :  { %v605_v32 = vpop.f32.mrf.mxu0 }
  0xdb   :  { %626 = vmatprep.mubr.msk.f32.mxu1 %vm254_vm1, %v241_v30  ;;  %v244_v35 = vmax.f32 %v605_v32, 0.0 }
  0xdc   :  { %v188_v33 = vpop.f32.mrf.mxu0  ;;  %627 = vmatmul.mubr.msk.f32.gmra.mxu1 %vm254_vm1, %v242_v31 }
  0xdd   :  { %v243_v34 = vmax.f32 %v188_v33, 0.0 }
  0xde   :  { %v608_v36 = vpop.f32.mrf.mxu0 }
  0xdf   :  { %629 = vmatprep.mubr.msk.f32.mxu1 %vm254_vm1, %v243_v34  ;;  %v246_v39 = vmax.f32 %v608_v36, 0.0 }
  0xe0   :  { %v198_v37 = vpop.f32.mrf.mxu0  ;;  %630 = vmatmul.mubr.msk.f32.gmra.mxu1 %vm254_vm1, %v244_v35 }
  0xe1   :  { %v245_v38 = vmax.f32 %v198_v37, 0.0 }
  0xe2   :  { %v611_v40 = vpop.f32.mrf.mxu0 }
  0xe3   :  { %632 = vmatprep.mubr.msk.f32.mxu1 %vm254_vm1, %v245_v38  ;;  %v248_v43 = vmax.f32 %v611_v40, 0.0 }
  0xe4   :  { %v208_v41 = vpop.f32.mrf.mxu0  ;;  %633 = vmatmul.mubr.msk.f32.gmra.mxu1 %vm254_vm1, %v246_v39 }
  0xe5   :  { %v247_v42 = vmax.f32 %v208_v41, 0.0 }
  0xe6   :  { %v614_v44 = vpop.f32.mrf.mxu0 }
  0xe7   :  { %635 = vmatprep.mubr.msk.f32.mxu1 %vm254_vm1, %v247_v42  ;;  %v250_v47 = vmax.f32 %v614_v44, 0.0 }
  0xe8   :  { %v218_v45 = vpop.f32.mrf.mxu0  ;;  %636 = vmatmul.mubr.msk.f32.gmra.mxu1 %vm254_vm1, %v248_v43 }
  0xe9   :  { %v249_v46 = vmax.f32 %v218_v45, 0.0 }
  0xea   :  { %v617_v48 = vpop.f32.mrf.mxu0 }
  0xeb   :  { %638 = vmatprep.mubr.msk.f32.mxu1 %vm254_vm1, %v249_v46  ;;  %v252_v51 = vmax.f32 %v617_v48, 0.0 }
  0xec   :  { %v228_v49 = vpop.f32.mrf.mxu0  ;;  %639 = vmatmul.mubr.msk.f32.gmra.mxu1 %vm254_vm1, %v250_v47 }
  0xed   :  { %v251_v50 = vmax.f32 %v228_v49, 0.0 }
  0xef   :  { %641 = vmatprep.mubr.msk.f32.mxu1 %vm254_vm1, %v251_v50 }
  0xf0   :  { %642 = vmatmul.mubr.msk.f32.gmra.mxu1 %vm254_vm1, %v252_v51 }
 0x194   :  { %v622_v52 = vpop.f32.mrf.mxu1 }
 0x195   :  { %vm452_vm3 = vcmp.gt.f32.partialorder %v622_v52, 0.0 }
 0x196   :  { %v468_v54 = vsel %vm452_vm3, 1.0, %v670_v53  ;;  %v372_v55 = vpop.f32.mrf.mxu1 }
 0x197   :  { %485 = vst.msk [vmem:[#allocation2 + $0x8] sm:$0xff] %vm483_vm2, %v468_v54  ;;  %vm451_vm4 = vcmp.gt.f32.partialorder %v372_v55, 0.0 }
 0x198   :  { %v467_v56 = vsel %vm451_vm4, 1.0, %v670_v53  ;;  %v625_v57 = vpop.f32.mrf.mxu1 }
 0x199   :  { %484 = vst.msk [vmem:[#allocation2] sm:$0xff] %vm483_vm2, %v467_v56  ;;  %vm454_vm5 = vcmp.gt.f32.partialorder %v625_v57, 0.0 }
 0x19a   :  { %v470_v58 = vsel %vm454_vm5, 1.0, %v670_v53  ;;  %v382_v59 = vpop.f32.mrf.mxu1 }
 0x19b   :  { %487 = vst.msk [vmem:[#allocation2 + $0x18] sm:$0xff] %vm483_vm2, %v470_v58  ;;  %vm453_vm6 = vcmp.gt.f32.partialorder %v382_v59, 0.0 }
 0x19c   :  { %v469_v60 = vsel %vm453_vm6, 1.0, %v670_v53  ;;  %v628_v61 = vpop.f32.mrf.mxu1 }
 0x19d   :  { %486 = vst.msk [vmem:[#allocation2 + $0x10] sm:$0xff] %vm483_vm2, %v469_v60  ;;  %vm456_vm7 = vcmp.gt.f32.partialorder %v628_v61, 0.0 }
 0x19e   :  { %v472_v62 = vsel %vm456_vm7, 1.0, %v670_v53  ;;  %v392_v63 = vpop.f32.mrf.mxu1 }
 0x19f   :  { %489 = vst.msk [vmem:[#allocation2 + $0x28] sm:$0xff] %vm483_vm2, %v472_v62  ;;  %vm455_vm8 = vcmp.gt.f32.partialorder %v392_v63, 0.0 }
 0x1a0   :  { %v471_v0 = vsel %vm455_vm8, 1.0, %v670_v53  ;;  %v631_v1 = vpop.f32.mrf.mxu1 }
 0x1a1   :  { %488 = vst.msk [vmem:[#allocation2 + $0x20] sm:$0xff] %vm483_vm2, %v471_v0  ;;  %vm458_vm9 = vcmp.gt.f32.partialorder %v631_v1, 0.0 }
 0x1a2   :  { %v474_v2 = vsel %vm458_vm9, 1.0, %v670_v53  ;;  %v402_v3 = vpop.f32.mrf.mxu1 }
 0x1a3   :  { %491 = vst.msk [vmem:[#allocation2 + $0x38] sm:$0xff] %vm483_vm2, %v474_v2  ;;  %vm457_vm10 = vcmp.gt.f32.partialorder %v402_v3, 0.0 }
 0x1a4   :  { %v473_v4 = vsel %vm457_vm10, 1.0, %v670_v53  ;;  %v634_v5 = vpop.f32.mrf.mxu1 }
 0x1a5   :  { %490 = vst.msk [vmem:[#allocation2 + $0x30] sm:$0xff] %vm483_vm2, %v473_v4  ;;  %vm460_vm11 = vcmp.gt.f32.partialorder %v634_v5, 0.0 }
 0x1a6   :  { %v476_v6 = vsel %vm460_vm11, 1.0, %v670_v53  ;;  %v412_v7 = vpop.f32.mrf.mxu1 }
 0x1a7   :  { %493 = vst.msk [vmem:[#allocation2 + $0x48] sm:$0xff] %vm483_vm2, %v476_v6  ;;  %vm459_vm12 = vcmp.gt.f32.partialorder %v412_v7, 0.0 }
 0x1a8   :  { %v475_v8 = vsel %vm459_vm12, 1.0, %v670_v53  ;;  %v637_v9 = vpop.f32.mrf.mxu1 }
 0x1a9   :  { %492 = vst.msk [vmem:[#allocation2 + $0x40] sm:$0xff] %vm483_vm2, %v475_v8  ;;  %vm462_vm13 = vcmp.gt.f32.partialorder %v637_v9, 0.0 }
 0x1aa   :  { %v478_v10 = vsel %vm462_vm13, 1.0, %v670_v53  ;;  %v422_v11 = vpop.f32.mrf.mxu1 }
 0x1ab   :  { %495 = vst.msk [vmem:[#allocation2 + $0x58] sm:$0xff] %vm483_vm2, %v478_v10  ;;  %vm461_vm14 = vcmp.gt.f32.partialorder %v422_v11, 0.0 }
 0x1ac   :  { %v477_v12 = vsel %vm461_vm14, 1.0, %v670_v53  ;;  %v640_v13 = vpop.f32.mrf.mxu1 }
 0x1ad   :  { %494 = vst.msk [vmem:[#allocation2 + $0x50] sm:$0xff] %vm483_vm2, %v477_v12  ;;  %vm464_vm15 = vcmp.gt.f32.partialorder %v640_v13, 0.0 }
 0x1ae   :  { %v480_v14 = vsel %vm464_vm15, 1.0, %v670_v53  ;;  %v432_v15 = vpop.f32.mrf.mxu1 }
 0x1af   :  { %497 = vst.msk [vmem:[#allocation2 + $0x68] sm:$0xff] %vm483_vm2, %v480_v14  ;;  %vm463_vm0 = vcmp.gt.f32.partialorder %v432_v15, 0.0 }
 0x1b0   :  { %v479_v16 = vsel %vm463_vm0, 1.0, %v670_v53  ;;  %v643_v17 = vpop.f32.mrf.mxu1 }
 0x1b1   :  { %496 = vst.msk [vmem:[#allocation2 + $0x60] sm:$0xff] %vm483_vm2, %v479_v16  ;;  %vm466_vm1 = vcmp.gt.f32.partialorder %v643_v17, 0.0 }
 0x1b2   :  { %v482_v18 = vsel %vm466_vm1, 1.0, %v670_v53  ;;  %v442_v19 = vpop.f32.mrf.mxu1 }
 0x1b3   :  { %499 = vst.msk [vmem:[#allocation2 + $0x78] sm:$0xff] %vm483_vm2, %v482_v18  ;;  %vm465_vm3 = vcmp.gt.f32.partialorder %v442_v19, 0.0 }
 0x1b4   :  { %v481_v20 = vsel %vm465_vm3, 1.0, %v670_v53 }
 0x1b5   :  { %498 = vst.msk [vmem:[#allocation2 + $0x70] sm:$0xff] %vm483_vm2, %v481_v20 }
 0x1b6   :  { %504 = vsyncadd [#allocation3], 1920  ;;  %s671_s0 = smov [#allocation2]  }
 0x1b7   :  { %s505_s2 = sshll.u32 %s671_s0, 4  ;;  %s506_s2 = int_to_ptr.vmem [resolvable:$true] %s505_s2 }
 0x1b8   :  { %s648_s24 = scalar_lea.vmem %s506_s2, 128  ;;  %s652_s1 = scalar_lea.vmem %s506_s2, 2048 }
 0x1b9   :  { %p649_p0 = scmp.ne.s32.totalorder %s506_s2, %s648_s24  ;;  %p653_p1 = scmp.lt.s32.totalorder %s506_s2, %s506_s2 }
 0x1ba   :  { %p654_p2 = scmp.lt.s32.totalorder %s652_s1, %s648_s24 }
 0x1bc   :  { %p655_p3 = por %p654_p2, %p653_p1 }
 0x1be   :  { %p656_p4 = pnand %p655_p3, %p649_p0 }
 0x1c0   :  { %659 = shalt.err (!%p656_p4)
}
 0x1c1   :  { %s672_s25 = smov 128   ;;  %s673_s26 = smov 8  }
 0x1c2   :  { %511 = dma.vmem_to_hbm [thread:$0]  %s506_s2, 128, %s816_s3, [#allocation3], %s672_s25, %s672_s25, %s673_s26  }
 0x1c3   :  { %668 = dma.done.wait [#allocation3], 2048  }
 0x1c4   :  { %669 = vsyncadd [#allocation3], 4294965248 }
 0x1c5   :  { %515 = vsyncpa [#allocation3], 1 }

</bundles_post_ra>
